<compile_context>
chip_gen: v7x
topology: tpu7x:2x2x1
jax: 0.10.0
libtpu: 0.0.40
codegen_flags: <defaults>
</compile_context>

<pallas_src>
import functools
import math

import jax
import jax.numpy as jnp
from jax.experimental import pallas as pl
from jax.experimental.pallas import tpu as pltpu

_EPS = 1e-12  # F.normalize eps


def _rowsum_kernel(x_ref, w_ref, inv_xs_ref, inv_wn_ref, bias_ref, rowsum_ref):
    """Pass 1: accumulate row_sum = sum_j exp(u) over class tiles."""
    raw = jnp.dot(x_ref[...], w_ref[...], preferred_element_type=jnp.float32)
    # u = s * (x_norm @ w_norm); padded classes get bias = -1e30 -> exp == 0.
    u = raw * inv_xs_ref[...] * inv_wn_ref[...] + bias_ref[...]

    @pl.when(pl.program_id(1) == 0)
    def _():
        rowsum_ref[...] = jnp.zeros_like(rowsum_ref)

    rowsum_ref[...] += jnp.sum(jnp.exp(u), axis=1, keepdims=True)


def _output_kernel(x_ref, w_ref, inv_xs_ref, inv_wn_ref, rowsum_ref, o_ref,
                   *, cos_m, k_sin, c1, approx_recip):
    """Pass 2: recompute the matmul tile and emit the final arcsoftmax."""
    raw = jnp.dot(x_ref[...], w_ref[...], preferred_element_type=jnp.float32)
    u = raw * inv_xs_ref[...] * inv_wn_ref[...]          # u = s * t
    e_plain = jnp.exp(u)                                  # exp(s*cosa*10)
    # cos(acos(cosa)+m) = cosa*cos m - sqrt(1-cosa^2)*sin m  (exact identity)
    sin_a = jnp.sqrt(jnp.maximum(1.0 - c1 * (u * u), 0.0))
    e_marg = jnp.exp(u * cos_m - k_sin * sin_a)           # exp(s*cos(a+m)*10)
    denom = rowsum_ref[...] - e_plain + e_marg
    o_ref[...] = e_marg * pl.reciprocal(denom, approx=approx_recip)


def _round_up(v, mult):
    return ((v + mult - 1) // mult) * mult


def arcsoftmax(x, w, s=1.0, m=0.2, *, mxu_dtype=jnp.bfloat16,
               tb_max=256, tc_max=512, approx_recip=False,
               vmem_limit_bytes=None):
    n, f = x.shape
    f2, c = w.shape
    assert f == f2
    s = float(s)
    m = float(m)

    # ---- wrapper-side precompute (hoisted out of the class-tile loop) ------
    x_f32 = x.astype(jnp.float32)
    w_f32 = w.astype(jnp.float32)
    # F.normalize: v / max(||v||, eps) == v * rsqrt(max(||v||^2, eps^2))
    inv_xs = s * jax.lax.rsqrt(
        jnp.maximum(jnp.sum(x_f32 * x_f32, axis=1, keepdims=True), _EPS * _EPS))
    inv_wn = jax.lax.rsqrt(
        jnp.maximum(jnp.sum(w_f32 * w_f32, axis=0, keepdims=True), _EPS * _EPS))
    x_mxu = x.astype(mxu_dtype)
    w_mxu = w.astype(mxu_dtype)

    # ---- tiles / padding ---------------------------------------------------
    tb = min(tb_max, _round_up(n, 8))
    n_pad = _round_up(n, tb)
    nb = n_pad // tb
    tc = min(tc_max, _round_up(c, 128))       # lane-dense; never full-C fallback
    c_pad = _round_up(c, tc)
    nc = c_pad // tc

    if n_pad != n:
        x_mxu = jnp.pad(x_mxu, ((0, n_pad - n), (0, 0)))
        inv_xs = jnp.pad(inv_xs, ((0, n_pad - n), (0, 0)))
    if c_pad != c:
        w_mxu = jnp.pad(w_mxu, ((0, 0), (0, c_pad - c)))
        inv_wn = jnp.pad(inv_wn, ((0, 0), (0, c_pad - c)))
    # Kills padded classes in the row sum: exp(0 + (-1e30)) == 0.
    col_bias = jnp.where(jnp.arange(c_pad)[None, :] < c, 0.0, -1e30
                         ).astype(jnp.float32)

    # ---- compiler params / cost estimates ----------------------------------
    mxu_b = jnp.dtype(mxu_dtype).itemsize
    if vmem_limit_bytes is None:
        per_step = (tb * f * mxu_b + f * tc * mxu_b + tb * tc * 4
                    + 2 * tc * 4 + 2 * tb * 4)
        vmem_limit_bytes = int(min(max(32 * 2**20, 2 * 2 * per_step),
                                   56 * 2**20))

    flops = 2 * n_pad * f * c_pad
    x_stream = n_pad * f * mxu_b              # x tile resident across class axis
    w_stream = nb * f * c_pad * mxu_b         # w re-streamed once per batch tile
    vec_stream = (2 * n_pad + 2 * c_pad) * 4
    cost1 = pl.CostEstimate(flops=int(flops),
                            transcendentals=int(n_pad * c_pad),
                            bytes_accessed=int(x_stream + w_stream + vec_stream))
    cost2 = pl.CostEstimate(flops=int(flops),
                            transcendentals=int(3 * n_pad * c_pad),
                            bytes_accessed=int(x_stream + w_stream + vec_stream
                                               + n_pad * c_pad * 4))

    # ---- pass 1: row sums ----------------------------------------------------
    row_sum = pl.pallas_call(
        _rowsum_kernel,
        out_shape=jax.ShapeDtypeStruct((n_pad, 1), jnp.float32),
        grid=(nb, nc),
        in_specs=[
            pl.BlockSpec((tb, f), lambda i, j: (i, 0)),
            pl.BlockSpec((f, tc), lambda i, j: (0, j)),
            pl.BlockSpec((tb, 1), lambda i, j: (i, 0)),
            pl.BlockSpec((1, tc), lambda i, j: (0, j)),
            pl.BlockSpec((1, tc), lambda i, j: (0, j)),
        ],
        out_specs=pl.BlockSpec((tb, 1), lambda i, j: (i, 0)),
        compiler_params=pltpu.CompilerParams(
            dimension_semantics=("parallel", "arbitrary"),
            vmem_limit_bytes=vmem_limit_bytes),
        cost_estimate=cost1,
    )(x_mxu, w_mxu, inv_xs, inv_wn, col_bias)

    # ---- pass 2: final output (matmul recomputed, no HBM intermediates) -----
    kernel2 = functools.partial(
        _output_kernel,
        cos_m=math.cos(m),
        k_sin=10.0 * s * math.sin(m),
        c1=0.01 / (s * s),
        approx_recip=approx_recip)

    out = pl.pallas_call(
        kernel2,
        out_shape=jax.ShapeDtypeStruct((n_pad, c_pad), jnp.float32),
        grid=(nb, nc),
        in_specs=[
            pl.BlockSpec((tb, f), lambda i, j: (i, 0)),
            pl.BlockSpec((f, tc), lambda i, j: (0, j)),
            pl.BlockSpec((tb, 1), lambda i, j: (i, 0)),
            pl.BlockSpec((1, tc), lambda i, j: (0, j)),
            pl.BlockSpec((tb, 1), lambda i, j: (i, 0)),
        ],
        out_specs=pl.BlockSpec((tb, tc), lambda i, j: (i, j)),
        compiler_params=pltpu.CompilerParams(
            dimension_semantics=("parallel", "parallel"),
            vmem_limit_bytes=vmem_limit_bytes),
        cost_estimate=cost2,
    )(x_mxu, w_mxu, inv_xs, inv_wn, row_sum)

    if n_pad != n or c_pad != c:
        out = out[:n, :c]
    return out


def arcsoftmax_ref(x, w, s=1.0, m=0.2):
    # Pure-JAX reference mirroring the PyTorch forward (uses arccos directly).
    x_norm = x / jnp.maximum(jnp.linalg.norm(x, axis=1, keepdims=True), _EPS)
    w_norm = w / jnp.maximum(jnp.linalg.norm(w, axis=0, keepdims=True), _EPS)
    cosa = (x_norm @ w_norm) / 10.0
    a = jnp.arccos(cosa)
    e_plain = jnp.exp(s * cosa * 10.0)
    e_marg = jnp.exp(s * jnp.cos(a + m) * 10.0)
    return e_marg / (jnp.sum(e_plain, axis=1, keepdims=True) - e_plain + e_marg)


if __name__ == "__main__":
    # Module __init__: w = randn((feature_num, cls_num)).
    batch, feature_num, cls_num = 8, 32, 128

    key = jax.random.PRNGKey(0)
    kx, kw = jax.random.split(key)
    x = jax.random.normal(kx, (batch, feature_num), dtype=jnp.float32)
    w = jax.random.normal(kw, (feature_num, cls_num), dtype=jnp.float32)

    # Production path: bf16 streaming of x and w (HBM-bound on w at real C).
    out_bf16 = jax.block_until_ready(arcsoftmax(x, w, s=1.0, m=0.2))
    # Full-precision path for a tight numerical check.
    out_f32 = jax.block_until_ready(
        arcsoftmax(x, w, s=1.0, m=0.2, mxu_dtype=jnp.float32))

    ref = arcsoftmax_ref(x, w, s=1.0, m=0.2)
    assert out_f32.shape == (batch, cls_num)
    assert jnp.allclose(out_f32, ref, rtol=1e-4, atol=1e-6), \
        "f32 kernel mismatch vs reference"
    assert jnp.allclose(out_bf16, ref, rtol=5e-2, atol=1e-3), \
        "bf16 kernel mismatch vs reference"

    # Non-divisible class count: exercises the pad-to-128 + column-mask path.
    cls_ragged = 200
    w2 = jax.random.normal(jax.random.PRNGKey(1), (feature_num, cls_ragged),
                           dtype=jnp.float32)
    out2 = jax.block_until_ready(
        arcsoftmax(x, w2, s=1.0, m=0.2, mxu_dtype=jnp.float32))
    ref2 = arcsoftmax_ref(x, w2, s=1.0, m=0.2)
    assert out2.shape == (batch, cls_ragged)
    assert jnp.allclose(out2, ref2, rtol=1e-4, atol=1e-6), \
        "padded-C kernel mismatch vs reference"

    print("KERNEL_OK")
</pallas_src>

<mosaic_0001>
module attributes {stable_mosaic.version = 11 : i64} {
  func.func @_rowsum_kernel(%arg0: i32, %arg1: i32, %arg2: memref<8x32xbf16, #tpu.memory_space<vmem>>, %arg3: memref<32x128xbf16, #tpu.memory_space<vmem>>, %arg4: memref<8x1xf32, #tpu.memory_space<vmem>>, %arg5: memref<1x128xf32, #tpu.memory_space<vmem>>, %arg6: memref<1x128xf32, #tpu.memory_space<vmem>>, %arg7: memref<8x1xf32, #tpu.memory_space<vmem>>) attributes {dimension_semantics = [#tpu.dimension_semantics<parallel>, #tpu.dimension_semantics<arbitrary>], iteration_bounds = array<i64: 1, 1>, scalar_prefetch = 0 : i64, scratch_operands = 0 : i64, tpu.core_type = #tpu.core_type<tc>, window_params = [{transform_indices = @transform_0, window_bounds = array<i64: 8, 32>}, {transform_indices = @transform_1, window_bounds = array<i64: 32, 128>}, {transform_indices = @transform_2, window_bounds = array<i64: 8, 1>}, {transform_indices = @transform_3, window_bounds = array<i64: 1, 128>}, {transform_indices = @transform_4, window_bounds = array<i64: 1, 128>}, {transform_indices = @transform_5, window_bounds = array<i64: 8, 1>}]} {
    %c0 = arith.constant 0 : index
    %c0_0 = arith.constant 0 : index
    %0 = vector.load %arg2[%c0, %c0_0] : memref<8x32xbf16, #tpu.memory_space<vmem>>, vector<8x32xbf16>
    %c0_1 = arith.constant 0 : index
    %c0_2 = arith.constant 0 : index
    %1 = vector.load %arg3[%c0_1, %c0_2] : memref<32x128xbf16, #tpu.memory_space<vmem>>, vector<32x128xbf16>
    %cst = arith.constant dense<0.000000e+00> : vector<8x128xf32>
    %2 = tpu.matmul %0, %1, %cst {dimension_numbers = #tpu.dot_dimension_numbers<[1], [0], [0], [1], [0, 0, 1, 1], [], []>} : vector<8x32xbf16>, vector<32x128xbf16>, vector<8x128xf32> -> vector<8x128xf32>
    %c0_3 = arith.constant 0 : index
    %c0_4 = arith.constant 0 : index
    %3 = vector.load %arg4[%c0_3, %c0_4] : memref<8x1xf32, #tpu.memory_space<vmem>>, vector<8x1xf32>
    %4 = vector.broadcast %3 : vector<8x1xf32> to vector<8x128xf32>
    %5 = arith.mulf %2, %4 : vector<8x128xf32>
    %c0_5 = arith.constant 0 : index
    %c0_6 = arith.constant 0 : index
    %6 = vector.load %arg5[%c0_5, %c0_6] : memref<1x128xf32, #tpu.memory_space<vmem>>, vector<1x128xf32>
    %7 = vector.broadcast %6 : vector<1x128xf32> to vector<8x128xf32>
    %8 = arith.mulf %5, %7 : vector<8x128xf32>
    %c0_7 = arith.constant 0 : index
    %c0_8 = arith.constant 0 : index
    %9 = vector.load %arg6[%c0_7, %c0_8] : memref<1x128xf32, #tpu.memory_space<vmem>>, vector<1x128xf32>
    %10 = vector.broadcast %9 : vector<1x128xf32> to vector<8x128xf32>
    %11 = arith.addf %8, %10 : vector<8x128xf32>
    %c0_i32 = arith.constant 0 : i32
    %12 = arith.cmpi eq, %arg1, %c0_i32 : i32
    %13 = arith.extui %12 : i1 to i32
    %c0_i32_9 = arith.constant 0 : i32
    %14 = arith.cmpi ne, %13, %c0_i32_9 : i32
    scf.if %14 {
      %cst_15 = arith.constant 0.000000e+00 : f32
      %21 = vector.broadcast %cst_15 : f32 to vector<8x1xf32>
      %c0_16 = arith.constant 0 : index
      %c0_17 = arith.constant 0 : index
      %22 = vector.load %arg7[%c0_16, %c0_17] : memref<8x1xf32, #tpu.memory_space<vmem>>, vector<8x1xf32>
      tpu.vector_store %arg7[%c0_16, %c0_17], %21 {strides = array<i32>} : memref<8x1xf32, #tpu.memory_space<vmem>>, vector<8x1xf32>,
    } else {
    }
    %c0_10 = arith.constant 0 : index
    %c0_11 = arith.constant 0 : index
    %15 = vector.load %arg7[%c0_10, %c0_11] : memref<8x1xf32, #tpu.memory_space<vmem>>, vector<8x1xf32>
    %16 = math.exp %11 : vector<8x128xf32>
    %cst_12 = arith.constant dense<0.000000e+00> : vector<8xf32>
    %17 = vector.multi_reduction <add>, %16, %cst_12 [1] : vector<8x128xf32> to vector<8xf32>
    %18 = vector.shape_cast %17 : vector<8xf32> to vector<8x1xf32>
    %19 = arith.addf %15, %18 : vector<8x1xf32>
    %c0_13 = arith.constant 0 : index
    %c0_14 = arith.constant 0 : index
    %20 = vector.load %arg7[%c0_13, %c0_14] : memref<8x1xf32, #tpu.memory_space<vmem>>, vector<8x1xf32>
    tpu.vector_store %arg7[%c0_13, %c0_14], %19 {strides = array<i32>} : memref<8x1xf32, #tpu.memory_space<vmem>>, vector<8x1xf32>,
    return
  }
  func.func @transform_0(%arg0: i32, %arg1: i32) -> (i32, i32) {
    %c0_i32 = arith.constant 0 : i32
    %c0_i32_0 = arith.constant 0 : i32
    return %arg0, %c0_i32 : i32, i32
  }
  func.func @transform_1(%arg0: i32, %arg1: i32) -> (i32, i32) {
    %c0_i32 = arith.constant 0 : i32
    %c0_i32_0 = arith.constant 0 : i32
    return %c0_i32, %arg1 : i32, i32
  }
  func.func @transform_2(%arg0: i32, %arg1: i32) -> (i32, i32) {
    %c0_i32 = arith.constant 0 : i32
    %c0_i32_0 = arith.constant 0 : i32
    return %arg0, %c0_i32 : i32, i32
  }
  func.func @transform_3(%arg0: i32, %arg1: i32) -> (i32, i32) {
    %c0_i32 = arith.constant 0 : i32
    %c0_i32_0 = arith.constant 0 : i32
    return %c0_i32, %arg1 : i32, i32
  }
  func.func @transform_4(%arg0: i32, %arg1: i32) -> (i32, i32) {
    %c0_i32 = arith.constant 0 : i32
    %c0_i32_0 = arith.constant 0 : i32
    return %c0_i32, %arg1 : i32, i32
  }
  func.func @transform_5(%arg0: i32, %arg1: i32) -> (i32, i32) {
    %c0_i32 = arith.constant 0 : i32
    %c0_i32_0 = arith.constant 0 : i32
    return %arg0, %c0_i32 : i32, i32
  }
}

</mosaic_0001>

<bundles_post_ra>
// kernel: tpu_custom_call.1
= control target key start
LH: loop header
LB: loop body
LE: loop exit
PB: predicated region body
PF: predicated region fallthrough
CT: control target
= control target key end

     0   :  { %10 = vsyncpa [#allocation3], 0  ;;  %s189_s18 = smov [#allocation2]   ;;  %s260_s0 = inlined_call_operand.vmem [shape: bf16[8,32], index: 0, kind: input, shape index: {}]   ;;  %s261_s1 = inlined_call_operand.hbm [shape: bf16[32,128], index: 1, kind: input, shape index: {}]   ;;  %s262_s2 = inlined_call_operand.vmem [shape: f32[8,1], index: 2, kind: input, shape index: {}]   ;;  %s263_s3 = inlined_call_operand.vmem [shape: f32[1,128], index: 3, kind: input, shape index: {}]   ;;  %s264_s4 = inlined_call_operand.vmem [shape: f32[1,128], index: 4, kind: input, shape index: {}]   ;;  %s265_s5 = inlined_call_operand.vmem [shape: f32[8,1], index: 5, kind: output, shape index: {}]  }
   0x1   :  { %s18_s19 = sshll.u32 %s189_s18, 4  ;;  %s165_s22 = scalar_lea.hbm %s261_s1, 256  ;;  %s19_s19 = int_to_ptr.vmem [resolvable:$true] %s18_s19 }
   0x2   :  { %p166_p0 = scmp.ne.s32.totalorder %s261_s1, %s165_s22  ;;  %p169_p1 = scmp.lt.u32.totalorder %s165_s22, %s261_s1 }
   0x4   :  { %p171_p2 = pnand %p169_p1, %p166_p0 }
   0x6   :  { %174 = shalt.err (!%p171_p2)
}
   0x7   :  { %s175_s27 = scalar_lea.vmem %s19_s19, 256  ;;  %p180_p4 = scmp.lt.s32.totalorder %s19_s19, %s19_s19 }
   0x8   :  { %p176_p3 = scmp.ne.s32.totalorder %s19_s19, %s175_s27  ;;  %p181_p5 = scmp.lt.s32.totalorder %s175_s27, %s175_s27 }
   0xa   :  { %p182_p6 = por %p181_p5, %p180_p4 }
   0xc   :  { %p183_p7 = pnand %p182_p6, %p176_p3 }
   0xe   :  { %186 = shalt.err (!%p183_p7)
}
   0xf   :  { %s190_s28 = smov 64   ;;  %s191_s29 = smov 4  }
  0x10   :  { %24 = dma.hbm_to_vmem [thread:$0]  %s261_s1, 256, %s19_s19, [#allocation3], %s190_s28, %s190_s28, %s191_s29  }
  0x11   :  { %187 = dma.done.wait [#allocation3], 256  }
  0x12   :  { %188 = vsyncadd [#allocation3], 4294967040  ;;  %vm123_vm0 = vcmask 7168   ;;  %v192_v0 = vmov 0.0   ;;  %vm193_vm1 = vmmov 0   ;;  %v194_v1 = vmov 0  }
  0x13   :  { %146 = vmatprep.subr.bf16.mxu0 %v192_v0  ;;  %124 = vst.msk [vmem:[%s265_s5] sm:$0xff] %vm123_vm0, %v192_v0  ;;  %150 = vmatprep.mubr.msk.bf16.mxu0 %vm193_vm1, %v192_v0  ;;  %v161_v2 = vld [vmem:[#allocation2] sm:$0xff]   ;;  %v162_v3 = vld [vmem:[#allocation2 + $0x8] sm:$0xff]   ;;  %vm52_vm2 = vcmask 261120  }
  0x14   :  { %160 = vset.pattern.permute.xlu0 %v194_v1  ;;  %147 = vmatpush3.bf16.msra.mxu0 %v161_v2  ;;  %v96_v4 = vld [vmem:[%s262_s2] sm:$0xff] }
  0x15   :  { %148 = vmatprep.subr.bf16.mxu0 %v192_v0  ;;  %99 = vperm.xlu0 %160, %v96_v4   ;;  %v35_v5 = vld [vmem:[%s260_s0] sm:$0xf] }
  0x16   :  { %v141_v8 = vld [vmem:[%s263_s3] ss:$0 sm:$0xff] }
  0x17   :  { %v142_v11 = vld [vmem:[%s264_s4] ss:$0 sm:$0xff] }
  0x18   :  { %149 = vmatpush3.bf16.msra.mxu0 %v162_v3 }
  0x1a   :  { %v125_v18 = vld [vmem:[%s265_s5] sm:$0xff] }
  0x1b   :  { %151 = vmatmul.mubr.msk.bf16.vlgmr.msra.gmra.mrb[0].mxu0 %vm52_vm2, %v35_v5 }
  0x94   :  { %v100_v6 = vpop.permute.xlu0 %99 }
  0xee   :  { %v90_v7 = vpop.f32.mrb[0].mxu0 }
  0xef   :  { %v102_v9 = vmul.f32 %v100_v6, %v90_v7  ;;  %v152_v10 = vpop.f32.mrb[1].mxu0 }
  0xf0   :  { %v93_v12 = vpop.f32.mrb[2].mxu0 }
  0xf1   :  { %v110_v13 = vmul.f32 %v141_v8, %v102_v9  ;;  %v153_v14 = vpop.f32.mrb[3].mxu0 }
  0xf3   :  { %v118_v15 = vadd.f32 %v142_v11, %v110_v13 }
  0xf5   :  { %v126_v16 = vmul.f32 1.442695, %v118_v15 }
  0xf7   :  { %163 = vpow2.f32 %v126_v16 }
 0x101   :  { %v164_v17 = vpop.eup %163 }
 0x102   :  { %128 = vadd.xlane.f32.xlu0 %v164_v17 }
 0x18f   :  { %v129_v19 = vpop.xlane.xlu0 %128 }
 0x190   :  { %v130_v20 = vadd.f32 %v129_v19, %v125_v18 }
 0x192   :  { %132 = vst.msk [vmem:[%s265_s5] sm:$0xff] %vm123_vm0, %v130_v20 }
 0x193   :  { %137 = vsyncpa [#allocation3], 1 }

</bundles_post_ra>
